<compile_context>
chip_gen: v7x
topology: tpu7x:2x2x1
jax: 0.10.0
libtpu: 0.0.40
codegen_flags: <defaults>
</compile_context>

<pallas_src>
import jax
import jax.numpy as jnp
import numpy as np
from jax.experimental import pallas as pl
from jax.experimental.pallas import tpu as pltpu


def _round_up(a, m):
    return (a + m - 1) // m * m


def _make_gcn_kernel(n_nodes, tk, x_resident, mask_tail):
    """Builds the kernel body, closing over trace-time constants."""

    def kernel(adj_ref, x_ref, w_ref, o_ref, acc_ref):
        k = pl.program_id(1)

        @pl.when(k == 0)
        def _():
            acc_ref[...] = jnp.zeros_like(acc_ref)

        adj_tile = adj_ref[...]
        if mask_tail:
            # adj is not padded in HBM, so the out-of-bounds columns of the
            # ragged last k block hold unspecified data; zero them before the
            # dot (VALU select -- free filler in this HBM-bound regime).
            col = jax.lax.broadcasted_iota(jnp.int32, adj_tile.shape, 1)
            valid = n_nodes - k * tk  # >= tk for all non-final blocks
            adj_tile = jnp.where(col < valid, adj_tile, 0.0)

        # bf16 MXU matmul with f32 accumulation; the cast hides under the
        # HBM stream of adj.
        adj_bf = adj_tile.astype(jnp.bfloat16)
        if x_resident:
            start = pl.multiple_of(k * tk, tk)
            x_tile = x_ref[pl.ds(start, tk), :]
        else:
            x_tile = x_ref[...]

        acc_ref[...] += jnp.dot(adj_bf, x_tile, preferred_element_type=jnp.float32)

        @pl.when(k == pl.num_programs(1) - 1)
        def _():
            # Tiny f32 projection to dim_out (bias already folded in);
            # lane-dense store.
            o_ref[...] = jnp.dot(
                acc_ref[...], w_ref[...], preferred_element_type=jnp.float32
            ).astype(o_ref.dtype)

    return kernel


@jax.jit
def my_gcn_layer(x, w, b, adj):
    n, dim_in = x.shape
    dim_out = w.shape[0]

    kin_p = _round_up(dim_in + 1, 128)
    dout_p = _round_up(dim_out, 128)

    # Tile sizes: a 512 x 2048 f32 adj tile is 4 MiB per grid step (>~1 us of
    # DMA even at v7x's ~3.2 TB/s, well above the ~0.35 us per-step overhead),
    # while double-buffered it stays ~8 MiB of VMEM.
    tm = min(512, _round_up(n, 8))
    tk = min(2048, _round_up(n, 128))

    n_row_tiles = pl.cdiv(n, tm)
    n_k_tiles = pl.cdiv(n, tk)
    n_rows_pad = n_row_tiles * tm
    n_cols_pad = n_k_tiles * tk
    mask_tail = (n % tk) != 0

    # Augmented activations [x | 1]: tiny (N x kin_p); zero-pad along the node
    # axis so every kernel-side slice is in-bounds, and cast to bf16.
    x_aug = jnp.concatenate([x, jnp.ones((n, 1), x.dtype)], axis=1)
    x_p = jnp.pad(
        x_aug, ((0, n_cols_pad - n), (0, kin_p - (dim_in + 1)))
    ).astype(jnp.bfloat16)

    # Augmented weights [W.T ; b], kept f32 (only (din+1) x dout -- negligible).
    w_aug = jnp.concatenate([w.T, b.reshape(1, dim_out)], axis=0)
    w_p = jnp.pad(w_aug, ((0, kin_p - (dim_in + 1)), (0, dout_p - dim_out)))

    # Keep [x|1] VMEM-resident (single DMA) when it fits comfortably;
    # otherwise fall back to streaming one (tk, kin_p) slab per k step.
    x_resident = n_cols_pad * kin_p * 2 * 2 <= 8 * 1024 * 1024
    if x_resident:
        x_spec = pl.BlockSpec((n_cols_pad, kin_p), lambda i, k: (0, 0))
    else:
        x_spec = pl.BlockSpec((tk, kin_p), lambda i, k: (k, 0))

    # TODO(synk): for dim_out in the thousands, add a third (parallel) grid
    # axis over dout and tile w/out to (kin_p, tn_out)/(tm, tn_out) so the
    # whole-dout blocks don't blow v7x's 64 MiB VMEM.

    kernel = _make_gcn_kernel(n, tk, x_resident, mask_tail)

    out_p = pl.pallas_call(
        kernel,
        out_shape=jax.ShapeDtypeStruct((n_rows_pad, dout_p), jnp.float32),
        grid_spec=pltpu.PrefetchScalarGridSpec(
            num_scalar_prefetch=0,
            grid=(n_row_tiles, n_k_tiles),
            in_specs=[
                # adj tile: f32 straight from the user array, streamed once.
                pl.BlockSpec((tm, tk), lambda i, k: (i, k)),
                # [x | 1]: VMEM-resident (or per-k slab) bf16.
                x_spec,
                # [W.T ; b]: whole array, VMEM-resident.
                pl.BlockSpec((kin_p, dout_p), lambda i, k: (0, 0)),
            ],
            out_specs=pl.BlockSpec((tm, dout_p), lambda i, k: (i, 0)),
            scratch_shapes=[pltpu.VMEM((tm, kin_p), jnp.float32)],
        ),
        compiler_params=pltpu.CompilerParams(
            dimension_semantics=("parallel", "arbitrary"),
            vmem_limit_bytes=32 * 1024 * 1024,
        ),
    )(adj, x_p, w_p)

    # No-op when shapes already line up; otherwise a small N x dim_out copy.
    return out_p[:n, :dim_out]


def _reference(x, w, b, adj):
    return adj @ (x @ w.T + b)


if __name__ == "__main__":
    # ---- Toy shapes implied by the module's example input: x is [8, 1]. ----
    N = 8
    DIM_IN = 1
    DIM_OUT = 8

    x = jnp.array(
        [[16.0], [14.0], [11.0], [15.0], [45.0], [40.0], [42.0], [48.0]],
        dtype=jnp.float32,
    )

    key = jax.random.PRNGKey(0)
    kw, kb, ka = jax.random.split(key, 3)
    bound = 1.0 / np.sqrt(DIM_IN)
    w = jax.random.uniform(kw, (DIM_OUT, DIM_IN), jnp.float32, -bound, bound)
    b = jax.random.uniform(kb, (DIM_OUT,), jnp.float32, -bound, bound)

    # Deterministic adjacency: self-loops + ring, row-normalized.
    adj_np = np.eye(N, dtype=np.float32)
    for i in range(N):
        adj_np[i, (i + 1) % N] = 1.0
        adj_np[i, (i - 1) % N] = 1.0
    adj_np = adj_np / adj_np.sum(axis=1, keepdims=True)
    adj = jnp.asarray(adj_np)

    out = jax.block_until_ready(my_gcn_layer(x, w, b, adj))
    ref = _reference(x, w, b, adj)
    # bf16 activations/adjacency (f32 accumulation) -> ~1e-2 relative accuracy.
    np.testing.assert_allclose(np.asarray(out), np.asarray(ref), rtol=2e-2, atol=2e-2)

    # ---- Larger shape exercising the real grid (2 row tiles, ragged k tail). ----
    N2, DIN2, DOUT2 = 1000, 16, 64
    k1, k2, k3, k4 = jax.random.split(jax.random.PRNGKey(1), 4)
    x2 = jax.random.normal(k1, (N2, DIN2), jnp.float32)
    w2 = jax.random.normal(k2, (DOUT2, DIN2), jnp.float32) * 0.1
    b2 = jax.random.normal(k3, (DOUT2,), jnp.float32) * 0.1
    adj2 = (jax.random.uniform(k4, (N2, N2), jnp.float32) < 0.01).astype(jnp.float32)
    adj2 = adj2 + jnp.eye(N2, dtype=jnp.float32)
    adj2 = adj2 / jnp.sum(adj2, axis=1, keepdims=True)

    out2 = jax.block_until_ready(my_gcn_layer(x2, w2, b2, adj2))
    ref2 = _reference(x2, w2, b2, adj2)
    np.testing.assert_allclose(np.asarray(out2), np.asarray(ref2), rtol=2e-2, atol=2e-2)

    print("KERNEL_OK")
</pallas_src>

<mosaic_0001>
module attributes {stable_mosaic.version = 11 : i64} {
  func.func @kernel(%arg0: i32, %arg1: i32, %arg2: memref<8x128xf32, #tpu.memory_space<vmem>>, %arg3: memref<128x128xbf16, #tpu.memory_space<vmem>>, %arg4: memref<128x128xf32, #tpu.memory_space<vmem>>, %arg5: memref<8x128xf32, #tpu.memory_space<vmem>>, %arg6: memref<8x128xf32, #tpu.memory_space<vmem>>) attributes {dimension_semantics = [#tpu.dimension_semantics<parallel>, #tpu.dimension_semantics<arbitrary>], iteration_bounds = array<i64: 1, 1>, scalar_prefetch = 0 : i64, scratch_operands = 1 : i64, tpu.core_type = #tpu.core_type<tc>, window_params = [{transform_indices = @transform_0, window_bounds = array<i64: 8, 128>}, {pipeline_mode = #tpu.pipeline_mode<synchronous>, transform_indices = @transform_1, window_bounds = array<i64: 128, 128>}, {pipeline_mode = #tpu.pipeline_mode<synchronous>, transform_indices = @transform_2, window_bounds = array<i64: 128, 128>}, {transform_indices = @transform_3, window_bounds = array<i64: 8, 128>}]} {
    %c0_i32 = arith.constant 0 : i32
    %0 = arith.cmpi eq, %arg1, %c0_i32 : i32
    %1 = arith.extui %0 : i1 to i32
    %c0_i32_0 = arith.constant 0 : i32
    %2 = arith.cmpi ne, %1, %c0_i32_0 : i32
    scf.if %2 {
      %cst_11 = arith.constant 0.000000e+00 : f32
      %23 = vector.broadcast %cst_11 : f32 to vector<8x128xf32>
      %c0_12 = arith.constant 0 : index
      %c0_13 = arith.constant 0 : index
      %24 = vector.load %arg6[%c0_12, %c0_13] : memref<8x128xf32, #tpu.memory_space<vmem>>, vector<8x128xf32>
      tpu.vector_store %arg6[%c0_12, %c0_13], %23 {strides = array<i32>} : memref<8x128xf32, #tpu.memory_space<vmem>>, vector<8x128xf32>,
    } else {
    }
    %c0 = arith.constant 0 : index
    %c0_1 = arith.constant 0 : index
    %3 = vector.load %arg2[%c0, %c0_1] : memref<8x128xf32, #tpu.memory_space<vmem>>, vector<8x128xf32>
    %4 = tpu.iota {dimensions = array<i32: 1>} : vector<8x128xi32>
    %c128_i32 = arith.constant 128 : i32
    %5 = arith.muli %arg1, %c128_i32 : i32
    %c8_i32 = arith.constant 8 : i32
    %6 = arith.subi %c8_i32, %5 : i32
    %7 = vector.broadcast %6 : i32 to vector<8x128xi32>
    %8 = arith.cmpi slt, %4, %7 : vector<8x128xi32>
    %cst = arith.constant 0.000000e+00 : f32
    %9 = vector.broadcast %cst : f32 to vector<8x128xf32>
    %10 = arith.select %8, %3, %9 : vector<8x128xi1>, vector<8x128xf32>
    %11 = arith.truncf %10 : vector<8x128xf32> to vector<8x128xbf16>
    %c128_i32_2 = arith.constant 128 : i32
    %12 = arith.muli %arg1, %c128_i32_2 : i32
    %13 = tpu.assume_multiple %12, 128 : i32
    %14 = arith.index_cast %13 : i32 to index
    %c0_3 = arith.constant 0 : index
    %15 = vector.load %arg3[%14, %c0_3] : memref<128x128xbf16, #tpu.memory_space<vmem>>, vector<128x128xbf16>
    %c0_4 = arith.constant 0 : index
    %c0_5 = arith.constant 0 : index
    %16 = vector.load %arg6[%c0_4, %c0_5] : memref<8x128xf32, #tpu.memory_space<vmem>>, vector<8x128xf32>
    %cst_6 = arith.constant dense<0.000000e+00> : vector<8x128xf32>
    %17 = tpu.matmul %11, %15, %cst_6 {dimension_numbers = #tpu.dot_dimension_numbers<[1], [0], [0], [1], [0, 0, 1, 1], [], []>} : vector<8x128xbf16>, vector<128x128xbf16>, vector<8x128xf32> -> vector<8x128xf32>
    %18 = arith.addf %16, %17 : vector<8x128xf32>
    %c0_7 = arith.constant 0 : index
    %c0_8 = arith.constant 0 : index
    %19 = vector.load %arg6[%c0_7, %c0_8] : memref<8x128xf32, #tpu.memory_space<vmem>>, vector<8x128xf32>
    tpu.vector_store %arg6[%c0_7, %c0_8], %18 {strides = array<i32>} : memref<8x128xf32, #tpu.memory_space<vmem>>, vector<8x128xf32>,
    %c0_i32_9 = arith.constant 0 : i32
    %20 = arith.cmpi eq, %arg1, %c0_i32_9 : i32
    %21 = arith.extui %20 : i1 to i32
    %c0_i32_10 = arith.constant 0 : i32
    %22 = arith.cmpi ne, %21, %c0_i32_10 : i32
    scf.if %22 {
      %c0_11 = arith.constant 0 : index
      %c0_12 = arith.constant 0 : index
      %23 = vector.load %arg6[%c0_11, %c0_12] : memref<8x128xf32, #tpu.memory_space<vmem>>, vector<8x128xf32>
      %c0_13 = arith.constant 0 : index
      %c0_14 = arith.constant 0 : index
      %24 = vector.load %arg4[%c0_13, %c0_14] : memref<128x128xf32, #tpu.memory_space<vmem>>, vector<128x128xf32>
      %cst_15 = arith.constant dense<0.000000e+00> : vector<8x128xf32>
      %25 = tpu.matmul %23, %24, %cst_15 {dimension_numbers = #tpu.dot_dimension_numbers<[1], [0], [0], [1], [0, 0, 1, 1], [], []>} : vector<8x128xf32>, vector<128x128xf32>, vector<8x128xf32> -> vector<8x128xf32>
      %c0_16 = arith.constant 0 : index
      %c0_17 = arith.constant 0 : index
      %26 = vector.load %arg5[%c0_16, %c0_17] : memref<8x128xf32, #tpu.memory_space<vmem>>, vector<8x128xf32>
      tpu.vector_store %arg5[%c0_16, %c0_17], %25 {strides = array<i32>} : memref<8x128xf32, #tpu.memory_space<vmem>>, vector<8x128xf32>,
    } else {
    }
    return
  }
  func.func @transform_0(%arg0: i32, %arg1: i32) -> (i32, i32) {
    %c0_i32 = arith.constant 0 : i32
    return %arg0, %arg1 : i32, i32
  }
  func.func @transform_1(%arg0: i32, %arg1: i32) -> (i32, i32) {
    %c0_i32 = arith.constant 0 : i32
    %c0_i32_0 = arith.constant 0 : i32
    %c0_i32_1 = arith.constant 0 : i32
    return %c0_i32, %c0_i32_0 : i32, i32
  }
  func.func @transform_2(%arg0: i32, %arg1: i32) -> (i32, i32) {
    %c0_i32 = arith.constant 0 : i32
    %c0_i32_0 = arith.constant 0 : i32
    %c0_i32_1 = arith.constant 0 : i32
    return %c0_i32, %c0_i32_0 : i32, i32
  }
  func.func @transform_3(%arg0: i32, %arg1: i32) -> (i32, i32) {
    %c0_i32 = arith.constant 0 : i32
    %c0_i32_0 = arith.constant 0 : i32
    return %arg0, %c0_i32 : i32, i32
  }
}

</mosaic_0001>

<bundles_post_ra>
// kernel: my_gcn_layer.1
= control target key start
LH: loop header
LB: loop body
LE: loop exit
PB: predicated region body
PF: predicated region fallthrough
CT: control target
= control target key end

     0   :  { %v400_v1 = vmov 0.0   ;;  %vm401_vm0 = vmmov 0   ;;  %v402_v3 = vmov 0.0|0.0   ;;  %s519_s0 = inlined_call_operand.vmem [shape: f32[8,8], index: 0, kind: input, shape index: {}]   ;;  %s520_s1 = inlined_call_operand.vmem [shape: bf16[128,128], index: 1, kind: input, shape index: {}]   ;;  %s521_s2 = inlined_call_operand.vmem [shape: f32[128,128], index: 2, kind: input, shape index: {}]   ;;  %s522_s3 = inlined_call_operand.hbm [shape: f32[8,128], index: 3, kind: output, shape index: {}]  }
   0x1   :  { %v368_v0 = vld [vmem:[%s520_s1] sm:$0xff]   ;;  %285 = vmatprep.subr.bf16.mxu0 %v400_v1  ;;  %v369_v2 = vld [vmem:[%s520_s1 + $0x8] sm:$0xff]   ;;  %301 = vmatprep.mubr.msk.bf16.mxu0 %vm401_vm0, %v400_v1  ;;  %v370_v4 = vld [vmem:[%s520_s1 + $0x10] sm:$0xff]  }
   0x2   :  { %286 = vmatpush3.bf16.msra.mxu0 %v368_v0  ;;  %337 = vmatprep.mubr.msk.f32.mxu1 %vm401_vm0, %v400_v1  ;;  %v145_v5 = vld [vmem:[%s521_s2] sm:$0xff]  ;;  %v146_v6 = vld [vmem:[%s521_s2 + $0x8] sm:$0xff]  ;;  %v147_v7 = vld [vmem:[%s521_s2 + $0x10] sm:$0xff] }
   0x3   :  { %287 = vmatprep.subr.bf16.mxu0 %v400_v1  ;;  %340 = vmatprep.subr.bf16.mxu1 %v402_v3  ;;  %v148_v8 = vld [vmem:[%s521_s2 + $0x18] sm:$0xff]  ;;  %v341_v10 = vpack.c.bf16 %v146_v6, %v145_v5  ;;  %v149_v12 = vld [vmem:[%s521_s2 + $0x20] sm:$0xff]  ;;  %v150_v13 = vld [vmem:[%s521_s2 + $0x28] sm:$0xff] }
   0x4   :  { %v371_v9 = vld [vmem:[%s520_s1 + $0x18] sm:$0xff]   ;;  %v344_v11 = vpack.c.bf16 %v148_v8, %v147_v7  ;;  %v372_v14 = vld [vmem:[%s520_s1 + $0x20] sm:$0xff]  }
   0x5   :  { %342 = vmatpush3.bf16.msra.mxu1 %v341_v10 }
   0x6   :  { %288 = vmatpush3.bf16.msra.mxu0 %v369_v2  ;;  %343 = vmatprep.subr.bf16.mxu1 %v402_v3 }
   0x7   :  { %289 = vmatprep.subr.bf16.mxu0 %v400_v1 }
   0xa   :  { %290 = vmatpush3.bf16.msra.mxu0 %v370_v4 }
   0xb   :  { %291 = vmatprep.subr.bf16.mxu0 %v400_v1 }
   0xe   :  { %292 = vmatpush3.bf16.msra.mxu0 %v371_v9 }
   0xf   :  { %8 = vsyncpa [#allocation4], 0  ;;  %293 = vmatprep.subr.bf16.mxu0 %v400_v1  ;;  %345 = vmatpush3.bf16.msra.mxu1 %v344_v11  ;;  %v347_v15 = vpack.c.bf16 %v150_v13, %v149_v12  ;;  %v151_v16 = vld [vmem:[%s521_s2 + $0x30] sm:$0xff]  ;;  %v152_v17 = vld [vmem:[%s521_s2 + $0x38] sm:$0xff]  ;;  %v22_v19 = vlaneseq  ;;  %s403_s6 = smov [#allocation3]  }
  0x10   :  { %346 = vmatprep.subr.bf16.mxu1 %v402_v3  ;;  %v373_v18 = vld [vmem:[%s520_s1 + $0x28] sm:$0xff]   ;;  %v350_v20 = vpack.c.bf16 %v152_v17, %v151_v16  ;;  %v153_v21 = vld [vmem:[%s521_s2 + $0x40] sm:$0xff]  ;;  %v374_v23 = vld [vmem:[%s520_s1 + $0x30] sm:$0xff]   ;;  %s238_s7 = sshll.u32 %s403_s6, 4  ;;  %s239_s7 = int_to_ptr.vmem [resolvable:$true] %s238_s7 }
  0x11   :  { %v154_v22 = vld [vmem:[%s521_s2 + $0x48] sm:$0xff]  ;;  %v23_v24 = vand.u32 127, %v22_v19  ;;  %v155_v26 = vld [vmem:[%s521_s2 + $0x50] sm:$0xff]  ;;  %v156_v27 = vld [vmem:[%s521_s2 + $0x58] sm:$0xff]  ;;  %s376_s8 = scalar_lea.vmem %s239_s7, 128  ;;  %p381_p1 = scmp.lt.s32.totalorder %s239_s7, %s239_s7 }
  0x12   :  { %294 = vmatpush3.bf16.msra.mxu0 %v372_v14  ;;  %v353_v25 = vpack.c.bf16 %v154_v22, %v153_v21  ;;  %v375_v28 = vld [vmem:[%s520_s1 + $0x38] sm:$0xff]   ;;  %v21_v29 = vld [vmem:[%s519_s0] sm:$0xff]  ;;  %v356_v30 = vpack.c.bf16 %v156_v27, %v155_v26  ;;  %v158_v33 = vld [vmem:[%s521_s2 + $0x68] sm:$0xff]  ;;  %p377_p0 = scmp.ne.s32.totalorder %s239_s7, %s376_s8  ;;  %p382_p2 = scmp.lt.s32.totalorder %s376_s8, %s376_s8 }
  0x13   :  { %295 = vmatprep.subr.bf16.mxu0 %v400_v1  ;;  %348 = vmatpush3.bf16.msra.mxu1 %v347_v15  ;;  %vm27_vm1 = vcmp.lt.s32.totalorder %v23_v24, 8  ;;  %v257_v31 = vpack.c.bf16 %v21_v29, %v21_v29  ;;  %v157_v32 = vld [vmem:[%s521_s2 + $0x60] sm:$0xff]  ;;  %v159_v35 = vld [vmem:[%s521_s2 + $0x70] sm:$0xff]  ;;  %v160_v36 = vld [vmem:[%s521_s2 + $0x78] sm:$0xff] }
  0x14   :  { %349 = vmatprep.subr.bf16.mxu1 %v402_v3  ;;  %vm256_vm2 = vmpackc.low %vm27_vm1, %vm27_vm1  ;;  %v359_v34 = vpack.c.bf16 %v158_v33, %v157_v32  ;;  %v362_v37 = vpack.c.bf16 %v160_v36, %v159_v35  ;;  %p383_p3 = por %p382_p2, %p381_p1 }
  0x16   :  { %296 = vmatpush3.bf16.msra.mxu0 %v373_v18  ;;  %p384_p4 = pnand %p383_p3, %p377_p0 }
  0x17   :  { %297 = vmatprep.subr.bf16.mxu0 %v400_v1  ;;  %351 = vmatpush3.bf16.msra.mxu1 %v350_v20 }
  0x18   :  { %352 = vmatprep.subr.bf16.mxu1 %v402_v3 }
  0x1a   :  { %298 = vmatpush3.bf16.msra.mxu0 %v374_v23 }
  0x1b   :  { %299 = vmatprep.subr.bf16.mxu0 %v400_v1  ;;  %354 = vmatpush3.bf16.msra.mxu1 %v353_v25 }
  0x1c   :  { %355 = vmatprep.subr.bf16.mxu1 %v402_v3 }
  0x1e   :  { %300 = vmatpush3.bf16.msra.mxu0 %v375_v28 }
  0x1f   :  { %357 = vmatpush3.bf16.msra.mxu1 %v356_v30 }
  0x20   :  { %358 = vmatprep.subr.bf16.mxu1 %v402_v3 }
  0x21   :  { %302 = vmatmul.mubr.msk.bf16.vlgmr.msra.gmra.mrb[0].mxu0 %vm256_vm2, %v257_v31 }
  0x23   :  { %360 = vmatpush3.bf16.msra.mxu1 %v359_v34 }
  0x24   :  { %361 = vmatprep.subr.bf16.mxu1 %v402_v3 }
  0x27   :  { %363 = vmatpush3.bf16.msra.mxu1 %v362_v37 }
  0xf4   :  { %v133_v38 = vpop.f32.mrb[0].mxu0 }
  0xf5   :  { %v303_v39 = vpop.f32.mrb[1].mxu0  ;;  %338 = vmatmul.mubr.f32.vlgmr.msra.gmra.mrb[0].mxu1 %v133_v38 }
  0xf6   :  { %v136_v40 = vpop.f32.mrb[2].mxu0 }
  0xf7   :  { %v304_v41 = vpop.f32.mrb[3].mxu0 }
 0x1c8   :  { %v227_v42 = vpop.f32.mrb[0].mxu1 }
 0x1c9   :  { %231 = vst [vmem:[#allocation3] sm:$0xff] %v227_v42  ;;  %v339_v43 = vpop.f32.mrb[1].mxu1 }
 0x1ca   :  { %387 = shalt.err (!%p384_p4)
}
 0x1cb   :  { %s388_s10 = scalar_lea.hbm %s522_s3, 128 }
 0x1cc   :  { %p389_p5 = scmp.ne.s32.totalorder %s522_s3, %s388_s10  ;;  %p392_p6 = scmp.lt.u32.totalorder %s388_s10, %s522_s3 }
 0x1ce   :  { %p394_p7 = pnand %p392_p6, %p389_p5 }
 0x1d0   :  { %397 = shalt.err (!%p394_p7)
}
 0x1d1   :  { %241 = dma.vmem_to_hbm [thread:$0]  %s239_s7, 128, %s522_s3, [#allocation4]  }
 0x1d2   :  { %398 = dma.done.wait [#allocation4], 128  }
 0x1d3   :  { %399 = vsyncadd [#allocation4], 4294967168 }
 0x1d4   :  { %245 = vsyncpa [#allocation4], 1 }

</bundles_post_ra>
